<compile_context>
chip_gen: v5e
topology: v5e:2x2
jax: 0.10.0
libtpu: 0.0.40
codegen_flags: <defaults>
</compile_context>

<pallas_src>
import numpy as np
import jax
import jax.numpy as jnp
from jax.experimental import pallas as pl
from jax.experimental.pallas import tpu as pltpu

EMBEDDING_SIZE = 256
NUM_FREQ = 64
FF_DIM = 2 * NUM_FREQ          # 128


def fourier_feature_kernel(alpha_ref,    # SMEM (2,)             PReLU alphas
                           sigma_ref,    # VMEM (TB, 1)    f32
                           freq2_ref,    # VMEM (1, 128)   f32   2*pi*[freq, freq]
                           phase_ref,    # VMEM (1, 128)   f32   [0]*64 + [-pi/2]*64
                           w1_ref,       # VMEM (128, 256) bf16  W1^T
                           b1_ref,       # VMEM (1, 256)   f32
                           w2_ref,       # VMEM (256, 256) bf16  W2^T
                           b2_ref,       # VMEM (1, 256)   f32
                           out_ref):     # VMEM (TB, 256)
    sigma = sigma_ref[...]                                   # (TB, 1)
    # cos(2*pi*f*s) ++ sin(2*pi*f*s) as one phase-offset cosine: 1 mul + 1 add.
    arg = sigma * freq2_ref[...] + phase_ref[...]            # (TB, 128)
    ff = jnp.cos(arg).astype(jnp.bfloat16)                   # (TB, 128) bf16

    # Linear(128 -> 256): single K=128 MXU matmul, f32 accumulation.
    h = jnp.dot(ff, w1_ref[...], preferred_element_type=jnp.float32) + b1_ref[...]
    a1 = alpha_ref[0]
    h = jnp.where(h >= 0.0, h, a1 * h)                       # PReLU (single alpha)

    # Linear(256 -> 256)
    h2 = (jnp.dot(h.astype(jnp.bfloat16), w2_ref[...],
                  preferred_element_type=jnp.float32) + b2_ref[...])
    a2 = alpha_ref[1]
    out_ref[...] = jnp.where(h2 >= 0.0, h2, a2 * h2).astype(out_ref.dtype)


def prepare_params(freq, w1, b1, alpha1, w2, b2, alpha2):
    """One-time parameter preparation (hoisted out of the forward path)."""
    freq2 = (2.0 * np.pi) * jnp.concatenate([freq, freq]).astype(jnp.float32)
    freq2 = freq2.reshape(1, FF_DIM)
    phase = jnp.concatenate([jnp.zeros((NUM_FREQ,), jnp.float32),
                             jnp.full((NUM_FREQ,), -np.pi / 2.0, jnp.float32)])
    phase = phase.reshape(1, FF_DIM)
    w1t = jnp.transpose(w1).astype(jnp.bfloat16)             # (128, 256)
    b1_2d = b1.reshape(1, EMBEDDING_SIZE).astype(jnp.float32)
    w2t = jnp.transpose(w2).astype(jnp.bfloat16)             # (256, 256)
    b2_2d = b2.reshape(1, EMBEDDING_SIZE).astype(jnp.float32)
    alphas = jnp.stack([jnp.asarray(alpha1, jnp.float32),
                        jnp.asarray(alpha2, jnp.float32)])   # (2,)
    return (freq2, phase, w1t, b1_2d, w2t, b2_2d, alphas)


def _round_up(x, m):
    return ((x + m - 1) // m) * m


def _pick_batch_tile(B):
    # Multiple of 16: bf16 operands pack 2 rows per sublane; 8-row tiles would
    # feed the MXU half-packed.  Cap 1024 keeps the worst case ~4 MiB of VMEM
    # (double-buffered out blocks + weights), well inside every chip's budget.
    tb = min(1024, max(16, _round_up(B, 16)))
    # Ensure >= 2 grid steps for non-trivial batches so dimension_semantics
    # ("parallel",) can shard the batch axis across v7x's two TensorCores.
    if B >= 64:
        tb = min(tb, max(16, _round_up(_round_up(B, 16) // 2, 16)))
    return tb


def fourier_feature_forward(sigma_t, params, *, tb=None, out_dtype=jnp.float32):
    """sigma_t: (B,) f32. Returns (B, EMBEDDING_SIZE) in out_dtype (default f32).

    Pass out_dtype=jnp.bfloat16 if the downstream FiLM consumer accepts bf16:
    the output store is ~99% of HBM bytes, so this halves the roofline cost.
    """
    freq2, phase, w1t, b1_2d, w2t, b2_2d, alphas = params
    B = sigma_t.shape[0]
    if tb is None:
        tb = _pick_batch_tile(B)
    grid = (pl.cdiv(B, tb),)

    sigma2d = sigma_t.reshape(B, 1).astype(jnp.float32)

    out_itemsize = jnp.dtype(out_dtype).itemsize
    cost = pl.CostEstimate(
        flops=2 * B * (FF_DIM * EMBEDDING_SIZE + EMBEDDING_SIZE * EMBEDDING_SIZE),
        transcendentals=FF_DIM * B,
        bytes_accessed=(w1t.size * 2 + w2t.size * 2
                        + b1_2d.size * 4 + b2_2d.size * 4
                        + B * 4 + B * EMBEDDING_SIZE * out_itemsize),
    )

    # out_shape is exactly (B, 256); when B is not a multiple of tb the last
    # block is ragged: Pallas masks the out-of-bounds output rows (and the
    # garbage in the padded input rows never reaches HBM), so no host-side
    # pad / slice of the dominant output stream is needed.
    return pl.pallas_call(
        fourier_feature_kernel,
        out_shape=jax.ShapeDtypeStruct((B, EMBEDDING_SIZE), out_dtype),
        grid=grid,
        in_specs=[
            pl.BlockSpec(memory_space=pltpu.MemorySpace.SMEM),                 # alphas
            pl.BlockSpec((tb, 1), lambda i: (i, 0)),                           # sigma
            pl.BlockSpec((1, FF_DIM), lambda i: (0, 0)),                       # freq2
            pl.BlockSpec((1, FF_DIM), lambda i: (0, 0)),                       # phase
            pl.BlockSpec((FF_DIM, EMBEDDING_SIZE), lambda i: (0, 0)),          # W1^T
            pl.BlockSpec((1, EMBEDDING_SIZE), lambda i: (0, 0)),               # b1
            pl.BlockSpec((EMBEDDING_SIZE, EMBEDDING_SIZE), lambda i: (0, 0)),  # W2^T
            pl.BlockSpec((1, EMBEDDING_SIZE), lambda i: (0, 0)),               # b2
        ],
        out_specs=pl.BlockSpec((tb, EMBEDDING_SIZE), lambda i: (i, 0)),
        compiler_params=pltpu.CompilerParams(
            dimension_semantics=("parallel",),
            vmem_limit_bytes=32 * 1024 * 1024),
        cost_estimate=cost,
    )(alphas, sigma2d, freq2, phase, w1t, b1_2d, w2t, b2_2d)


def ref_forward(sigma_t, freq, w1, b1, alpha1, w2, b2, alpha2):
    """Plain-JAX f32 reference mirroring the PyTorch module."""
    log_sigma = sigma_t[:, None]
    arg = 2.0 * np.pi * freq[None, :] * log_sigma
    ff = jnp.concatenate([jnp.cos(arg), jnp.sin(arg)], axis=-1)   # (B, 128)
    h = ff @ w1.T + b1
    h = jnp.where(h >= 0.0, h, alpha1 * h)
    h2 = h @ w2.T + b2
    return jnp.where(h2 >= 0.0, h2, alpha2 * h2)


def fourier_feature_apply(sigma_t, params, raw_params, *, min_pallas_batch=64):
    """Dispatcher: below the threshold the kernel is launch/DMA-bound (192 KiB
    of weights vs a handful of rows), so let XLA fuse the plain-JAX path."""
    if sigma_t.shape[0] < min_pallas_batch:
        return ref_forward(sigma_t, *raw_params)
    return fourier_feature_forward(sigma_t, params)


if __name__ == "__main__":
    key = jax.random.PRNGKey(0)
    k_freq, k_w1, k_b1, k_w2, k_b2, k_sig = jax.random.split(key, 6)

    # Deterministic synthetic parameters (same shapes as the PyTorch __init__).
    freq = jax.random.normal(k_freq, (NUM_FREQ,), jnp.float32) * 4.0
    w1 = jax.random.normal(k_w1, (EMBEDDING_SIZE, FF_DIM), jnp.float32) / np.sqrt(128.0)
    b1 = jax.random.normal(k_b1, (EMBEDDING_SIZE,), jnp.float32) * 0.01
    w2 = jax.random.normal(k_w2, (EMBEDDING_SIZE, EMBEDDING_SIZE), jnp.float32) / np.sqrt(256.0)
    b2 = jax.random.normal(k_b2, (EMBEDDING_SIZE,), jnp.float32) * 0.01
    alpha1 = jnp.float32(0.25)   # nn.PReLU default init
    alpha2 = jnp.float32(0.25)

    params = prepare_params(freq, w1, b1, alpha1, w2, b2, alpha2)
    raw = (freq, w1, b1, alpha1, w2, b2, alpha2)

    # Test 1: small batch, single (ragged) block — matches the module's typical
    # per-step diffusion-conditioning call.
    B = 8
    sigma_t = jax.random.uniform(k_sig, (B,), jnp.float32, minval=-1.0, maxval=1.0)
    out = jax.block_until_ready(fourier_feature_forward(sigma_t, params))
    ref = ref_forward(sigma_t, *raw)
    # bf16 MXU operands (f32 accumulation) -> ~1e-2-level absolute error budget.
    np.testing.assert_allclose(np.asarray(out), np.asarray(ref), rtol=2e-2, atol=2e-2)

    # Test 2: multi-step grid with a ragged last block (B=40, tb=16 -> grid=3),
    # exercising the masked last-block output path with no pad/slice.
    B2 = 40
    sigma_t2 = jax.random.uniform(jax.random.PRNGKey(1), (B2,), jnp.float32,
                                  minval=-1.0, maxval=1.0)
    out2 = jax.block_until_ready(fourier_feature_forward(sigma_t2, params, tb=16))
    ref2 = ref_forward(sigma_t2, *raw)
    np.testing.assert_allclose(np.asarray(out2), np.asarray(ref2), rtol=2e-2, atol=2e-2)

    print("KERNEL_OK")
</pallas_src>

<mosaic_0001>
module attributes {stable_mosaic.version = 11 : i64} {
  func.func @fourier_feature_kernel(%arg0: i32, %arg1: memref<2xf32, #tpu.memory_space<smem>>, %arg2: memref<16x1xf32, #tpu.memory_space<vmem>>, %arg3: memref<1x128xf32, #tpu.memory_space<vmem>>, %arg4: memref<1x128xf32, #tpu.memory_space<vmem>>, %arg5: memref<128x256xbf16, #tpu.memory_space<vmem>>, %arg6: memref<1x256xf32, #tpu.memory_space<vmem>>, %arg7: memref<256x256xbf16, #tpu.memory_space<vmem>>, %arg8: memref<1x256xf32, #tpu.memory_space<vmem>>, %arg9: memref<16x256xf32, #tpu.memory_space<vmem>>) attributes {dimension_semantics = [#tpu.dimension_semantics<parallel>], iteration_bounds = array<i64: 1>, scalar_prefetch = 0 : i64, scratch_operands = 0 : i64, tpu.core_type = #tpu.core_type<tc>, window_params = [{transform_indices = @transform_0, window_bounds = array<i64: 2>}, {transform_indices = @transform_1, window_bounds = array<i64: 16, 1>}, {pipeline_mode = #tpu.pipeline_mode<synchronous>, transform_indices = @transform_2, window_bounds = array<i64: 1, 128>}, {pipeline_mode = #tpu.pipeline_mode<synchronous>, transform_indices = @transform_3, window_bounds = array<i64: 1, 128>}, {pipeline_mode = #tpu.pipeline_mode<synchronous>, transform_indices = @transform_4, window_bounds = array<i64: 128, 256>}, {pipeline_mode = #tpu.pipeline_mode<synchronous>, transform_indices = @transform_5, window_bounds = array<i64: 1, 256>}, {pipeline_mode = #tpu.pipeline_mode<synchronous>, transform_indices = @transform_6, window_bounds = array<i64: 256, 256>}, {pipeline_mode = #tpu.pipeline_mode<synchronous>, transform_indices = @transform_7, window_bounds = array<i64: 1, 256>}, {transform_indices = @transform_8, window_bounds = array<i64: 16, 256>}]} {
    %c0 = arith.constant 0 : index
    %c0_0 = arith.constant 0 : index
    %0 = vector.load %arg2[%c0, %c0_0] : memref<16x1xf32, #tpu.memory_space<vmem>>, vector<16x1xf32>
    %c0_1 = arith.constant 0 : index
    %c0_2 = arith.constant 0 : index
    %1 = vector.load %arg3[%c0_1, %c0_2] : memref<1x128xf32, #tpu.memory_space<vmem>>, vector<1x128xf32>
    %2 = vector.broadcast %0 : vector<16x1xf32> to vector<16x128xf32>
    %3 = vector.broadcast %1 : vector<1x128xf32> to vector<16x128xf32>
    %4 = arith.mulf %2, %3 : vector<16x128xf32>
    %c0_3 = arith.constant 0 : index
    %c0_4 = arith.constant 0 : index
    %5 = vector.load %arg4[%c0_3, %c0_4] : memref<1x128xf32, #tpu.memory_space<vmem>>, vector<1x128xf32>
    %6 = vector.broadcast %5 : vector<1x128xf32> to vector<16x128xf32>
    %7 = arith.addf %4, %6 : vector<16x128xf32>
    %8 = math.cos %7 : vector<16x128xf32>
    %9 = arith.truncf %8 : vector<16x128xf32> to vector<16x128xbf16>
    %c0_5 = arith.constant 0 : index
    %c0_6 = arith.constant 0 : index
    %10 = vector.load %arg5[%c0_5, %c0_6] : memref<128x256xbf16, #tpu.memory_space<vmem>>, vector<128x256xbf16>
    %cst = arith.constant dense<0.000000e+00> : vector<16x256xf32>
    %11 = tpu.matmul %9, %10, %cst {dimension_numbers = #tpu.dot_dimension_numbers<[1], [0], [0], [1], [0, 0, 1, 1], [], []>} : vector<16x128xbf16>, vector<128x256xbf16>, vector<16x256xf32> -> vector<16x256xf32>
    %c0_7 = arith.constant 0 : index
    %c0_8 = arith.constant 0 : index
    %12 = vector.load %arg6[%c0_7, %c0_8] : memref<1x256xf32, #tpu.memory_space<vmem>>, vector<1x256xf32>
    %13 = vector.broadcast %12 : vector<1x256xf32> to vector<16x256xf32>
    %14 = arith.addf %11, %13 : vector<16x256xf32>
    %c0_9 = arith.constant 0 : index
    %15 = memref.load %arg1[%c0_9] : memref<2xf32, #tpu.memory_space<smem>>
    %cst_10 = arith.constant 0.000000e+00 : f32
    %16 = vector.broadcast %cst_10 : f32 to vector<16x256xf32>
    %17 = arith.cmpf oge, %14, %16 : vector<16x256xf32>
    %18 = vector.broadcast %15 : f32 to vector<16x256xf32>
    %19 = arith.mulf %18, %14 : vector<16x256xf32>
    %20 = arith.select %17, %14, %19 : vector<16x256xi1>, vector<16x256xf32>
    %21 = arith.truncf %20 : vector<16x256xf32> to vector<16x256xbf16>
    %c0_11 = arith.constant 0 : index
    %c0_12 = arith.constant 0 : index
    %22 = vector.load %arg7[%c0_11, %c0_12] : memref<256x256xbf16, #tpu.memory_space<vmem>>, vector<256x256xbf16>
    %cst_13 = arith.constant dense<0.000000e+00> : vector<16x256xf32>
    %23 = tpu.matmul %21, %22, %cst_13 {dimension_numbers = #tpu.dot_dimension_numbers<[1], [0], [0], [1], [0, 0, 1, 1], [], []>} : vector<16x256xbf16>, vector<256x256xbf16>, vector<16x256xf32> -> vector<16x256xf32>
    %c0_14 = arith.constant 0 : index
    %c0_15 = arith.constant 0 : index
    %24 = vector.load %arg8[%c0_14, %c0_15] : memref<1x256xf32, #tpu.memory_space<vmem>>, vector<1x256xf32>
    %25 = vector.broadcast %24 : vector<1x256xf32> to vector<16x256xf32>
    %26 = arith.addf %23, %25 : vector<16x256xf32>
    %c1 = arith.constant 1 : index
    %27 = memref.load %arg1[%c1] : memref<2xf32, #tpu.memory_space<smem>>
    %cst_16 = arith.constant 0.000000e+00 : f32
    %28 = vector.broadcast %cst_16 : f32 to vector<16x256xf32>
    %29 = arith.cmpf oge, %26, %28 : vector<16x256xf32>
    %30 = vector.broadcast %27 : f32 to vector<16x256xf32>
    %31 = arith.mulf %30, %26 : vector<16x256xf32>
    %32 = arith.select %29, %26, %31 : vector<16x256xi1>, vector<16x256xf32>
    %c0_17 = arith.constant 0 : index
    %c0_18 = arith.constant 0 : index
    %33 = vector.load %arg9[%c0_17, %c0_18] : memref<16x256xf32, #tpu.memory_space<vmem>>, vector<16x256xf32>
    tpu.vector_store %arg9[%c0_17, %c0_18], %32 {strides = array<i32>} : memref<16x256xf32, #tpu.memory_space<vmem>>, vector<16x256xf32>,
    return
  }
  func.func @transform_0(%arg0: i32) -> i32 {
    %c0_i32 = arith.constant 0 : i32
    %c0_i32_0 = arith.constant 0 : i32
    return %c0_i32 : i32
  }
  func.func @transform_1(%arg0: i32) -> (i32, i32) {
    %c0_i32 = arith.constant 0 : i32
    %c0_i32_0 = arith.constant 0 : i32
    return %arg0, %c0_i32 : i32, i32
  }
  func.func @transform_2(%arg0: i32) -> (i32, i32) {
    %c0_i32 = arith.constant 0 : i32
    %c0_i32_0 = arith.constant 0 : i32
    %c0_i32_1 = arith.constant 0 : i32
    return %c0_i32, %c0_i32_0 : i32, i32
  }
  func.func @transform_3(%arg0: i32) -> (i32, i32) {
    %c0_i32 = arith.constant 0 : i32
    %c0_i32_0 = arith.constant 0 : i32
    %c0_i32_1 = arith.constant 0 : i32
    return %c0_i32, %c0_i32_0 : i32, i32
  }
  func.func @transform_4(%arg0: i32) -> (i32, i32) {
    %c0_i32 = arith.constant 0 : i32
    %c0_i32_0 = arith.constant 0 : i32
    %c0_i32_1 = arith.constant 0 : i32
    return %c0_i32, %c0_i32_0 : i32, i32
  }
  func.func @transform_5(%arg0: i32) -> (i32, i32) {
    %c0_i32 = arith.constant 0 : i32
    %c0_i32_0 = arith.constant 0 : i32
    %c0_i32_1 = arith.constant 0 : i32
    return %c0_i32, %c0_i32_0 : i32, i32
  }
  func.func @transform_6(%arg0: i32) -> (i32, i32) {
    %c0_i32 = arith.constant 0 : i32
    %c0_i32_0 = arith.constant 0 : i32
    %c0_i32_1 = arith.constant 0 : i32
    return %c0_i32, %c0_i32_0 : i32, i32
  }
  func.func @transform_7(%arg0: i32) -> (i32, i32) {
    %c0_i32 = arith.constant 0 : i32
    %c0_i32_0 = arith.constant 0 : i32
    %c0_i32_1 = arith.constant 0 : i32
    return %c0_i32, %c0_i32_0 : i32, i32
  }
  func.func @transform_8(%arg0: i32) -> (i32, i32) {
    %c0_i32 = arith.constant 0 : i32
    %c0_i32_0 = arith.constant 0 : i32
    return %arg0, %c0_i32 : i32, i32
  }
}

</mosaic_0001>

<bundles_post_ra>
// kernel: tpu_custom_call.1
= control target key start
LH: loop header
LB: loop body
LE: loop exit
PB: predicated region body
PF: predicated region fallthrough
CT: control target
= control target key end

     0   :  { %13 = vsyncpa [#allocation5], 0  ;;  %s1536_s0 = inlined_call_operand.vmem [shape: f32[2], index: 0, kind: input, shape index: {}]   ;;  %s1537_s1 = inlined_call_operand.vmem [shape: f32[8,1], index: 1, kind: input, shape index: {}]   ;;  %s1538_s2 = inlined_call_operand.vmem [shape: f32[1,128], index: 2, kind: input, shape index: {}]   ;;  %s1539_s3 = inlined_call_operand.vmem [shape: f32[1,128], index: 3, kind: input, shape index: {}]   ;;  %s1540_s4 = inlined_call_operand.hbm [shape: bf16[128,256], index: 4, kind: input, shape index: {}]   ;;  %s1541_s5 = inlined_call_operand.vmem [shape: f32[1,256], index: 5, kind: input, shape index: {}]   ;;  %s1542_s6 = inlined_call_operand.hbm [shape: bf16[256,256], index: 6, kind: input, shape index: {}]   ;;  %s1543_s7 = inlined_call_operand.vmem [shape: f32[1,256], index: 7, kind: input, shape index: {}]   ;;  %s1544_s8 = inlined_call_operand.hbm [shape: f32[8,256], index: 8, kind: output, shape index: {}]  }
   0x1   :  { %14 = vsyncpa [#allocation3], 0 }
   0x2   :  { %15 = vsyncpa [#allocation8], 0 }
   0x3   :  { %16 = vsyncpa [#allocation4], 0  ;;  %s22_s29 = sshll.u32 %s1536_s0, 4  ;;  %s36_s10 = sshll.u32 %s1540_s4, 4  ;;  %s23_s29 = int_to_ptr.vmem [resolvable:$true] %s22_s29  ;;  %s37_s10 = int_to_ptr.hbm [resolvable:$true] %s36_s10 }
   0x4   :  { %s1204_s11 = smov [#allocation2]   ;;  %s1205_s12 = smov [#allocation6]  }
   0x5   :  { %25 = dma.vmem_to_smem %s23_s29, 16, %s1204_s11, [#allocation5]  }
   0x6   :  { %s38_s13 = sshll.u32 %s1205_s12, 4  ;;  %s1206_s14 = smov 128   ;;  %s39_s13 = int_to_ptr.vmem [resolvable:$true] %s38_s13 }
   0x7   :  { %s1207_s15 = smov 8   ;;  %s51_s18 = sshll.u32 %s1542_s6, 4  ;;  %s52_s18 = int_to_ptr.hbm [resolvable:$true] %s51_s18 }
   0x8   :  { %44 = dma.hbm_to_vmem [thread:$0]  %s37_s10, 2048, %s39_s13, [#allocation3], %s1206_s14, %s1206_s14, %s1207_s15  }
   0x9   :  { %s1208_s0 = smov [#allocation7]  }
   0xa   :  { %s53_s19 = sshll.u32 %s1208_s0, 4  ;;  %s54_s19 = int_to_ptr.vmem [resolvable:$true] %s53_s19 }
   0xb   :  { %59 = dma.hbm_to_vmem [thread:$0]  %s52_s18, 4096, %s54_s19, [#allocation8], %s1206_s14, %s1206_s14, %s1207_s15  }
   0xc   :  { %1196 = dma.done.wait [#allocation5], 16  }
   0xd   :  { %1197 = vsyncadd [#allocation5], 4294967280 }
   0xe   :  { %1198 = dma.done.wait [#allocation3], 2048  }
   0xf   :  { %1199 = vsyncadd [#allocation3], 4294965248 }
  0x10   :  { %1200 = dma.done.wait [#allocation8], 4096  }
  0x11   :  { %1201 = vsyncadd [#allocation8], 4294963200 }
  0x12   :  { %74 = sfence }
  0x13   :  { %v75_v0 = vld [vmem:[%s1537_s1] sm:$0xff]  ;;  %v1209_v1 = vmov 0   ;;  %v76_v2 = vld [vmem:[%s1537_s1 + $0x8] sm:$0xff]  ;;  %v911_v6 = vld [vmem:[#allocation6 + $0x70] sm:$0xf]  ;;  %s1045_s27 = sld [smem:[#allocation2 + $0x1]] }
  0x14   :  { %1109 = vset.pattern.permute.xlu0 %v1209_v1  ;;  %v1110_v3 = vld [vmem:[%s1538_s2] ss:$0 sm:$0xff]  ;;  %v1061_v7 = vld [vmem:[#allocation6 + $0x74] sm:$0xf0]  ;;  %v1060_v8 = vld [vmem:[#allocation6 + $0x74] sm:$0xf] }
  0x15   :  { %80 = vperm.xlu0 %1109, %v75_v0   ;;  %v1111_v4 = vld [vmem:[%s1539_s3] ss:$0 sm:$0xff]  ;;  %v912_v10 = vor.u32 %v1061_v7, %v911_v6  ;;  %v913_v11 = vld [vmem:[#allocation6 + $0x78] sm:$0xf0]  ;;  %v1059_v13 = vld [vmem:[#allocation6 + $0x64] sm:$0xf0] }
  0x16   :  { %v903_v12 = vld [vmem:[#allocation6 + $0x60] sm:$0xf]  ;;  %v916_v14 = vor.u32 %v1060_v8, %v913_v11  ;;  %v1058_v15 = vld [vmem:[#allocation6 + $0x64] sm:$0xf]  ;;  %v905_v16 = vld [vmem:[#allocation6 + $0x68] sm:$0xf0] }
  0x17   :  { %510 = vmatpush.bf16.msra.mxu0 %v912_v10  ;;  %v904_v18 = vor.u32 %v1059_v13, %v903_v12  ;;  %v908_v19 = vor.u32 %v1058_v15, %v905_v16  ;;  %v895_v20 = vld [vmem:[#allocation6 + $0x50] sm:$0xf]  ;;  %v1057_v21 = vld [vmem:[#allocation6 + $0x54] sm:$0xf0]  ;;  %v1056_v23 = vld [vmem:[#allocation6 + $0x54] sm:$0xf] }
  0x18   :  { %524 = vmatpush.bf16.msra.mxu1 %v916_v14  ;;  %v897_v24 = vld [vmem:[#allocation6 + $0x58] sm:$0xf0]  ;;  %v896_v26 = vor.u32 %v1057_v21, %v895_v20  ;;  %v887_v27 = vld [vmem:[#allocation6 + $0x40] sm:$0xf]  ;;  %v1055_v30 = vld [vmem:[#allocation6 + $0x44] sm:$0xf0] }
  0x19   :  { %v900_v29 = vor.u32 %v1056_v23, %v897_v24  ;;  %v1054_v31 = vld [vmem:[#allocation6 + $0x44] sm:$0xf]  ;;  %v889_v32 = vld [vmem:[#allocation6 + $0x48] sm:$0xf0]  ;;  %v879_v35 = vld [vmem:[#allocation6 + $0x30] sm:$0xf]  ;;  %v888_v45 = vor.u32 %v1055_v30, %v887_v27 }
  0x1a   :  { %v1053_v36 = vld [vmem:[#allocation6 + $0x34] sm:$0xf0]  ;;  %v1052_v37 = vld [vmem:[#allocation6 + $0x34] sm:$0xf]  ;;  %v881_v38 = vld [vmem:[#allocation6 + $0x38] sm:$0xf0]  ;;  %v892_v50 = vor.u32 %v1054_v31, %v889_v32 }
  0x1b   :  { %511 = vmatpush.bf16.msra.mxu0 %v904_v18  ;;  %v1289_v39 = vld [vmem:[#allocation6 + $0x20] sm:$0xf]  ;;  %v1291_v40 = vld [vmem:[#allocation6 + $0x24] sm:$0xf0]  ;;  %v1293_v41 = vld [vmem:[#allocation6 + $0x24] sm:$0xf]  ;;  %v880_v58 = vor.u32 %v1053_v36, %v879_v35  ;;  %v884_v59 = vor.u32 %v1052_v37, %v881_v38 }
  0x1c   :  { %525 = vmatpush.bf16.msra.mxu1 %v908_v19  ;;  %v1295_v42 = vld [vmem:[#allocation6 + $0x28] sm:$0xf0]  ;;  %v1299_v46 = vld [vmem:[#allocation6 + $0x10] sm:$0xf]  ;;  %v1301_v47 = vld [vmem:[#allocation6 + $0x14] sm:$0xf0]  ;;  %v872_v62 = vor.u32 %v1291_v40, %v1289_v39 }
  0x1d   :  { %85 = vperm.xlu0 %1109, %v76_v2   ;;  %v1303_v48 = vld [vmem:[#allocation6 + $0x14] sm:$0xf]  ;;  %v1305_v49 = vld [vmem:[#allocation6 + $0x18] sm:$0xf0]  ;;  %v1307_v51 = vld [vmem:[#allocation6] sm:$0xf]  ;;  %v876_v63 = vor.u32 %v1293_v41, %v1295_v42  ;;  %v864_v0 = vor.u32 %v1301_v47, %v1299_v46 }
  0x1e   :  { %v1309_v52 = vld [vmem:[#allocation6 + $0x4] sm:$0xf0]  ;;  %v1311_v53 = vld [vmem:[#allocation6 + $0x4] sm:$0xf]  ;;  %v1314_v55 = vld [vmem:[#allocation6 + $0x8] sm:$0xf0]  ;;  %v868_v2 = vor.u32 %v1303_v48, %v1305_v49 }
  0x1f   :  { %512 = vmatpush.bf16.msra.mxu0 %v896_v26  ;;  %v1211_v11 = vmov 920167782   ;;  %v1212_v14 = vmov 683565275   ;;  %v1213_v18 = vmov 1326507024  }
  0x20   :  { %526 = vmatpush.bf16.msra.mxu1 %v900_v29  ;;  %v1214_v20 = vmov 2475754826   ;;  %v1215_v24 = vmov 2131351028   ;;  %s538_s3 = sld [smem:[#allocation2]] }
  0x23   :  { %513 = vmatpush.bf16.msra.mxu0 %v888_v45 }
  0x24   :  { %527 = vmatpush.bf16.msra.mxu1 %v892_v50 }
  0x27   :  { %514 = vmatpush.bf16.msra.mxu0 %v880_v58 }
  0x28   :  { %528 = vmatpush.bf16.msra.mxu1 %v884_v59 }
  0x2b   :  { %515 = vmatpush.bf16.msra.mxu0 %v872_v62 }
  0x2c   :  { %529 = vmatpush.bf16.msra.mxu1 %v876_v63 }
  0x2f   :  { %516 = vmatpush.bf16.msra.mxu0 %v864_v0 }
  0x30   :  { %530 = vmatpush.bf16.msra.mxu1 %v868_v2 }
  0x87   :  { %v81_v5 = vpop.permute.xlu0 %80 }
  0x88   :  { %v91_v9 = vmul.f32 %v1110_v3, %v81_v5 }
  0x8a   :  { %v1286_v17 = vadd.f32 %v1111_v4, %v91_v9  ;;  %v1210_v9 = vmov 2102212464  }
  0x8c   :  { %v102_v22 = vand.u32 2139095040, %v1286_v17  ;;  %v99_v56 = vand.u32 2147483647, %v1286_v17 }
  0x8e   :  { %v103_v25 = vshrl.u32 %v102_v22, 23  ;;  %v106_v7 = vand.u32 8388607, %v99_v56 }
  0x8f   :  { %v86_v28 = vpop.permute.xlu0 %85 }
  0x90   :  { %v847_v33 = vadd.s32 4294967169, %v103_v25  ;;  %v92_v34 = vmul.f32 %v1110_v3, %v86_v28  ;;  %v856_v3 = vor.u32 %v1309_v52, %v1307_v51  ;;  %v107_v30 = vor.u32 8388608, %v106_v7 }
  0x92   :  { %v109_v43 = vadd.s32 1, %v847_v33  ;;  %v1297_v44 = vadd.f32 %v1111_v4, %v92_v34  ;;  %v860_v4 = vor.u32 %v1311_v53, %v1314_v55  ;;  %517 = vmatpush.bf16.msra.mxu0 %v856_v3 }
  0x94   :  { %vm110_vm0 = vcmp.gt.s32.totalorder %v109_v43, 0  ;;  %v256_v54 = vand.u32 2139095040, %v1297_v44  ;;  %v253_v8 = vand.u32 2147483647, %v1297_v44  ;;  %531 = vmatpush.bf16.msra.mxu1 %v860_v4 }
  0x95   :  { %v111_v57 = vsel %vm110_vm0, %v109_v43, 0 }
  0x96   :  { %v113_v60 = vand.u32 31, %v111_v57  ;;  %v257_v61 = vshrl.u32 %v256_v54, 23  ;;  %v1329_v5 = vshrl.u32 %v111_v57, 5  ;;  %v1354_v39 = vand.u32 8388607, %v253_v8 }
  0x97   :  { %v1377_v54 = vshll.u32 %v107_v30, 8 }
  0x98   :  { %v114_v6 = vsub.s32 32, %v113_v60  ;;  %v125_v10 = vshll.u32 %v1210_v9, %v113_v60  ;;  %v128_v12 = vshll.u32 %v1211_v11, %v113_v60  ;;  %v850_v13 = vadd.s32 4294967169, %v257_v61 }
  0x99   :  { %v116_v15 = vshll.u32 %v1212_v14, %v113_v60  ;;  %v119_v22 = vshll.u32 %v1214_v20, %v113_v60  ;;  %v122_v26 = vshll.u32 %v1215_v24, %v113_v60  ;;  %vm134_vm1 = vcmp.lt.s32.totalorder %v1329_v5, 4 }
  0x9a   :  { %v126_v16 = vshrl.u32 %v1211_v11, %v114_v6  ;;  %v129_v19 = vshrl.u32 %v1213_v18, %v114_v6  ;;  %v117_v21 = vshrl.u32 %v1214_v20, %v114_v6  ;;  %v263_v23 = vadd.s32 1, %v850_v13 }
  0x9b   :  { %v120_v25 = vshrl.u32 %v1215_v24, %v114_v6  ;;  %v123_v27 = vshrl.u32 %v1210_v9, %v114_v6  ;;  %vm131_vm3 = vcmp.lt.s32.totalorder %v1329_v5, 1  ;;  %vm133_vm4 = vcmp.lt.s32.totalorder %v1329_v5, 3 }
  0x9c   :  { %v127_v28 = vor.u32 %v126_v16, %v125_v10  ;;  %v130_v29 = vor.u32 %v129_v19, %v128_v12  ;;  %v118_v31 = vor.u32 %v117_v21, %v116_v15  ;;  %vm264_vm2 = vcmp.gt.s32.totalorder %v263_v23, 0 }
  0x9d   :  { %v121_v32 = vor.u32 %v120_v25, %v119_v22  ;;  %v124_v33 = vor.u32 %v123_v27, %v122_v26  ;;  %v265_v36 = vsel %vm264_vm2, %v263_v23, 0  ;;  %vm132_vm5 = vcmp.lt.s32.totalorder %v1329_v5, 2 }
  0x9e   :  { %v140_v34 = vsel %vm134_vm1, %v127_v28, 920167782  ;;  %v144_v35 = vsel %vm134_vm1, %v130_v29, 1326507024  ;;  %v1347_v37 = vand.u32 31, %v265_v36  ;;  %v1363_v43 = vshrl.u32 %v265_v36, 5 }
  0x9f   :  { %v139_v38 = vsel %vm131_vm3, %v118_v31, %v121_v32  ;;  %v141_v40 = vsel %vm133_vm4, %v124_v33, %v140_v34  ;;  %v143_v41 = vsel %vm131_vm3, %v121_v32, %v124_v33  ;;  %v145_v42 = vsel %vm133_vm4, %v127_v28, %v144_v35 }
  0xa0   :  { %v1366_v45 = vsub.s32 32, %v1347_v37  ;;  %v279_v46 = vshll.u32 %v1210_v9, %v1347_v37  ;;  %v136_v47 = vsel %vm134_vm1, %v124_v33, 2102212464  ;;  %v282_v48 = vshll.u32 %v1211_v11, %v1347_v37 }
  0xa1   :  { %v142_v49 = vsel %vm132_vm5, %v139_v38, %v141_v40  ;;  %v146_v50 = vsel %vm132_vm5, %v143_v41, %v145_v42  ;;  %v115_v61 = vshrl.u32 %v1212_v14, %v114_v6  ;;  %v148_v62 = vand.u32 65535, %v1377_v54 }
  0xa2   :  { %v280_v57 = vshrl.u32 %v1211_v11, %v1366_v45  ;;  %v283_v58 = vshrl.u32 %v1213_v18, %v1366_v45  ;;  %v150_v59 = vand.u32 65535, %v146_v50  ;;  %v151_v60 = vshrl.u32 %v146_v50, 16 }
  0xa3   :  { %v149_v63 = vshrl.u32 %v1377_v54, 16  ;;  %v173_v0 = vshrl.u32 %v142_v49, 16  ;;  %v172_v12 = vand.u32 65535, %v142_v49  ;;  %v135_v11 = vsel %vm131_vm3, %v115_v61, %v118_v31 }
  0xa4   :  { %v281_v7 = vor.u32 %v280_v57, %v279_v46  ;;  %v284_v10 = vor.u32 %v283_v58, %v282_v48  ;;  %v137_v2 = vsel %vm133_vm4, %v121_v32, %v136_v47  ;;  %v153_v13 = vmul.u32 %v151_v60, %v148_v62 }
  0xa5   :  { %v154_v6 = vmul.u32 %v150_v59, %v149_v63  ;;  %vm288_vm6 = vcmp.lt.s32.totalorder %v1363_v43, 4  ;;  %v152_v15 = vmul.u32 %v150_v59, %v148_v62  ;;  %v175_v16 = vmul.u32 %v173_v0, %v148_v62 }
  0xa6   :  { %v261_v18 = vor.u32 8388608, %v1354_v39  ;;  %v294_v51 = vsel %vm288_vm6, %v281_v7, 920167782  ;;  %v298_v52 = vsel %vm288_vm6, %v284_v10, 1326507024  ;;  %v155_v3 = vmul.u32 %v151_v60, %v149_v63 }
  0xa7   :  { %v156_v19 = vshll.u32 %v153_v13, 16  ;;  %v157_v21 = vshrl.u32 %v153_v13, 16  ;;  %v174_v22 = vmul.u32 %v172_v12, %v148_v62  ;;  %v176_v23 = vmul.u32 %v172_v12, %v149_v63 }
  0xa8   :  { %v178_v25 = vshll.u32 %v175_v16, 16  ;;  %v158_v26 = vshll.u32 %v154_v6, 16  ;;  %v159_v27 = vshrl.u32 %v154_v6, 16  ;;  %v177_v4 = vmul.u32 %v173_v0, %v149_v63 }
  0xa9   :  { %vm160_vm7 = vc.u32 %v152_v15, %v156_v19  ;;  %v162_v53 = vadd.s32 %v156_v19, %v152_v15  ;;  %v180_v28 = vshll.u32 %v176_v23, 16  ;;  %v270_v34 = vshll.u32 %v1212_v14, %v1347_v37 }
  0xaa   :  { %v161_v55 = vsel %vm160_vm7, 1, %v1209_v1  ;;  %vm182_vm8 = vc.u32 %v174_v22, %v178_v25  ;;  %v184_v31 = vadd.s32 %v178_v25, %v174_v22  ;;  %v271_v35 = vshrl.u32 %v1214_v20, %v1366_v45 }
  0xab   :  { %v163_v29 = vadd.s32 %v161_v55, %v155_v3  ;;  %vm164_vm9 = vc.u32 %v162_v53, %v158_v26  ;;  %v183_v30 = vsel %vm182_vm8, 1, %v1209_v1  ;;  %v273_v38 = vshll.u32 %v1214_v20, %v1347_v37 }
  0xac   :  { %v165_v32 = vsel %vm164_vm9, 1, %v1209_v1  ;;  %v185_v33 = vadd.s32 %v183_v30, %v177_v4  ;;  %vm186_vm10 = vc.u32 %v184_v31, %v180_v28  ;;  %v274_v39 = vshrl.u32 %v1215_v24, %v1366_v45 }
  0xad   :  { %v167_v36 = vadd.s32 %v165_v32, %v163_v29  ;;  %v187_v40 = vsel %vm186_vm10, 1, %v1209_v1  ;;  %v1412_v41 = vor.u32 %v271_v35, %v270_v34  ;;  %v276_v42 = vshll.u32 %v1215_v24, %v1347_v37 }
  0xae   :  { %v277_v46 = vshrl.u32 %v1210_v9, %v1366_v45  ;;  %v179_v48 = vshrl.u32 %v175_v16, 16  ;;  %v189_v49 = vadd.s32 %v187_v40, %v185_v33  ;;  %v1418_v50 = vor.u32 %v274_v39, %v273_v38 }
  0xaf   :  { %v168_v47 = vadd.s32 %v167_v36, %v157_v21  ;;  %v181_v57 = vshrl.u32 %v176_v23, 16  ;;  %vm285_vm11 = vcmp.lt.s32.totalorder %v1363_v43, 1  ;;  %vm287_vm12 = vcmp.lt.s32.totalorder %v1363_v43, 3 }
  0xb0   :  { %v278_v20 = vor.u32 %v277_v46, %v276_v42  ;;  %v190_v59 = vadd.s32 %v189_v49, %v179_v48  ;;  %v293_v24 = vsel %vm285_vm11, %v1412_v41, %v1418_v50  ;;  %v299_v9 = vsel %vm287_vm12, %v281_v7, %v298_v52 }
  0xb1   :  { %v1422_v58 = vadd.s32 %v168_v47, %v159_v27  ;;  %v1430_v37 = vadd.s32 %v184_v31, %v180_v28  ;;  %v1437_v62 = vshll.u32 %v261_v18, 8  ;;  %v138_v63 = vsel %vm132_vm5, %v135_v11, %v137_v2 }
  0xb2   :  { %v295_v60 = vsel %vm287_vm12, %v278_v20, %v294_v51  ;;  %v297_v61 = vsel %vm285_vm11, %v1418_v50, %v278_v20  ;;  %v191_v0 = vadd.s32 %v190_v59, %v181_v57  ;;  %vm286_vm13 = vcmp.lt.s32.totalorder %v1363_v43, 2 }
  0xb3   :  { %vm194_vm14 = vc.u32 %v1422_v58, %v1430_v37  ;;  %v296_v7 = vsel %vm286_vm13, %v293_v24, %v295_v60  ;;  %v300_v10 = vsel %vm286_vm13, %v297_v61, %v299_v9  ;;  %v302_v12 = vand.u32 65535, %v1437_v62 }
  0xb4   :  { %v195_v13 = vadd.s32 1, %v191_v0  ;;  %v303_v6 = vshrl.u32 %v1437_v62, 16  ;;  %v304_v15 = vand.u32 65535, %v300_v10  ;;  %v305_v5 = vshrl.u32 %v300_v10, 16 }
  0xb5   :  { %v192_v11 = vmul.u32 %v1377_v54, %v138_v63  ;;  %v326_v2 = vand.u32 65535, %v296_v7  ;;  %v327_v16 = vshrl.u32 %v296_v7, 16  ;;  %v290_v34 = vsel %vm288_vm6, %v278_v20, 2102212464 }
  0xb6   :  { %v196_v18 = vsel %vm194_vm14, %v195_v13, %v191_v0  ;;  %v307_v51 = vmul.u32 %v305_v5, %v302_v12  ;;  %v308_v52 = vmul.u32 %v304_v15, %v303_v6  ;;  %v306_v21 = vmul.u32 %v304_v15, %v302_v12 }
  0xb7   :  { %v197_v3 = vadd.s32 %v196_v18, %v192_v11  ;;  %v329_v19 = vmul.u32 %v327_v16, %v302_v12  ;;  %v309_v25 = vmul.u32 %v305_v5, %v303_v6  ;;  %v330_v26 = vmul.u32 %v326_v2, %v303_v6 }
  0xb8   :  { %v310_v22 = vshll.u32 %v307_v51, 16  ;;  %v312_v53 = vshll.u32 %v308_v52, 16  ;;  %v328_v4 = vmul.u32 %v326_v2, %v302_v12  ;;  %v331_v29 = vmul.u32 %v327_v16, %v303_v6 }
  0xb9   :  { %v198_v23 = vadd.s32 536870912, %v197_v3  ;;  %v332_v27 = vshll.u32 %v329_v19, 16  ;;  %v334_v30 = vshll.u32 %v330_v26, 16  ;;  %v311_v38 = vshrl.u32 %v307_v51, 16 }
  0xba   :  { %vm314_vm15 = vc.u32 %v306_v21, %v310_v22  ;;  %v316_v55 = vadd.s32 %v310_v22, %v306_v21  ;;  %v269_v46 = vshrl.u32 %v1212_v14, %v1366_v45  ;;  %v313_v48 = vshrl.u32 %v308_v52, 16 }
  0xbb   :  { %v1451_v28 = vshrl.u32 %v198_v23, 30  ;;  %v315_v54 = vsel %vm314_vm15, 1, %v1209_v1  ;;  %vm336_vm1 = vc.u32 %v328_v4, %v332_v27  ;;  %v338_v32 = vadd.s32 %v332_v27, %v328_v4 }
  0xbc   :  { %v317_v31 = vadd.s32 %v315_v54, %v309_v25  ;;  %vm318_vm0 = vc.u32 %v316_v55, %v312_v53  ;;  %v337_v36 = vsel %vm336_vm1, 1, %v1209_v1  ;;  %v333_v57 = vshrl.u32 %v329_v19, 16 }
  0xbd   :  { %v200_v33 = vshll.u32 %v1451_v28, 30  ;;  %v319_v35 = vsel %vm318_vm0, 1, %v1209_v1  ;;  %v339_v40 = vadd.s32 %v337_v36, %v331_v29  ;;  %vm340_vm2 = vc.u32 %v338_v32, %v334_v30 }
  0xbe   :  { %v321_v39 = vadd.s32 %v319_v35, %v317_v31  ;;  %v341_v47 = vsel %vm340_vm2, 1, %v1209_v1  ;;  %v289_v24 = vsel %vm285_vm11, %v269_v46, %v1412_v41  ;;  %v291_v9 = vsel %vm287_vm12, %v1418_v50, %v290_v34 }
  0xbf   :  { %v201_v42 = vsub.s32 %v197_v3, %v200_v33  ;;  %v343_v59 = vadd.s32 %v341_v47, %v339_v40  ;;  %v335_v61 = vshrl.u32 %v330_v26, 16  ;;  %v342_v45 = vadd.s32 %v338_v32, %v334_v30 }
  0xc0   :  { %v322_v49 = vadd.s32 %v321_v39, %v311_v38  ;;  %v292_v0 = vsel %vm286_vm13, %v289_v24, %v291_v9  ;;  %v193_v50 = vadd.s32 %v1430_v37, %v1422_v58  ;;  %vm101_vm7 = vcmp.lt.s32.totalorder %v1286_v17, 0 }
  0xc1   :  { %vm202_vm3 = vcmp.lt.s32.totalorder %v201_v42, 0  ;;  %v203_v20 = vsub.s32 0, %v201_v42  ;;  %v344_v63 = vadd.s32 %v343_v59, %v333_v57  ;;  %v346_v13 = vmul.u32 %v1437_v62, %v292_v0  ;;  %v1077_v57 = vld [vmem:[#allocation7 + $0x74] sm:$0xf0]  ;;  %v1039_v59 = vld [vmem:[#allocation7 + $0xf0] sm:$0xf] }
  0xc2   :  { %v323_v60 = vadd.s32 %v322_v49, %v313_v48  ;;  %vm1479_vm8 = vcmp.le.f32.partialorder %v99_v56, 0.7853982  ;;  %vm255_vm10 = vcmp.lt.s32.totalorder %v1297_v44, 0  ;;  %v975_v49 = vld [vmem:[#allocation7 + $0x70] sm:$0xf]  ;;  %vm242_vm2 = vweird.f32 %v1286_v17 }
  0xc3   :  { %v204_v14 = vsel %vm202_vm3, %v203_v20, %v201_v42  ;;  %v345_v7 = vadd.s32 %v344_v63, %v335_v61  ;;  %v976_v9 = vor.u32 %v1077_v57, %v975_v49  ;;  %v1076_v61 = vld [vmem:[#allocation7 + $0x74] sm:$0xf]  ;;  %vm1501_vm11 = vcmp.le.f32.partialorder %v253_v8, 0.7853982  ;;  %v1087_v49 = vld [vmem:[#allocation7 + $0xc4] sm:$0xf0] }
  0xc4   :  { %v205_v1 = vclz %v204_v14  ;;  %vm348_vm4 = vc.u32 %v323_v60, %v342_v45  ;;  %v347_v31 = vadd.s32 %v342_v45, %v323_v60  ;;  %v1093_v60 = vld [vmem:[#allocation7 + $0xf4] sm:$0xf0]  ;;  %v1092_v0 = vld [vmem:[#allocation7 + $0xf4] sm:$0xf]  ;;  %vm396_vm3 = vweird.f32 %v1297_v44 }
  0xc5   :  { %v349_v12 = vadd.s32 1, %v345_v7  ;;  %v1040_v45 = vor.u32 %v1093_v60, %v1039_v59  ;;  %752 = vmatpush.bf16.msra.mxu2 %v976_v9  ;;  %v1086_v9 = vld [vmem:[#allocation7 + $0xc4] sm:$0xf] }
  0xc6   :  { %v848_v10 = vadd.s32 4294967294, %v205_v1  ;;  %v977_v1 = vld [vmem:[#allocation7 + $0x78] sm:$0xf0] }
  0xc7   :  { %v350_v41 = vsel %vm348_vm4, %v349_v12, %v345_v7  ;;  %v1041_v12 = vld [vmem:[#allocation7 + $0xf8] sm:$0xf0]  ;;  %766 = vmatpush.bf16.msra.mxu3 %v1040_v45  ;;  %v1017_v45 = vld [vmem:[#allocation7 + $0xc8] sm:$0xf0] }
  0xc8   :  { %vm849_vm5 = vcmp.lt.s32.totalorder %v848_v10, 0  ;;  %v351_v15 = vadd.s32 %v350_v41, %v346_v13  ;;  %v967_v13 = vld [vmem:[#allocation7 + $0x60] sm:$0xf]  ;;  %v1075_v41 = vld [vmem:[#allocation7 + $0x64] sm:$0xf0] }
  0xc9   :  { %v208_v6 = vsel %vm849_vm5, 0, %v848_v10  ;;  %v980_v10 = vor.u32 %v1076_v61, %v977_v1  ;;  %v1020_v1 = vor.u32 %v1086_v9, %v1017_v45  ;;  %v1081_v9 = vld [vmem:[#allocation7 + $0x94] sm:$0xf0]  ;;  %v1080_v45 = vld [vmem:[#allocation7 + $0x94] sm:$0xf] }
  0xca   :  { %v209_v5 = vsub.s32 32, %v208_v6  ;;  %v213_v11 = vsub.s32 4294967266, %v208_v6  ;;  %v352_v2 = vadd.s32 536870912, %v351_v15  ;;  %v210_v16 = vshll.u32 %v201_v42, %v208_v6 }
  0xcb   :  { %780 = vmatpush.bf16.msrb.mxu0 %v980_v10 }
  0xcc   :  { %v211_v18 = vshrl.u32 %v193_v50, %v209_v5  ;;  %v214_v43 = vadd.s32 127, %v213_v11  ;;  %v1473_v51 = vshrl.u32 %v352_v2, 30  ;;  %v968_v50 = vor.u32 %v1075_v41, %v967_v13  ;;  %v1031_v5 = vld [vmem:[#allocation7 + $0xe0] sm:$0xf]  ;;  %v1091_v11 = vld [vmem:[#allocation7 + $0xe4] sm:$0xf0] }
  0xcd   :  { %v223_v2 = vsub.s32 4, %v1451_v28 }
  0xce   :  { %v212_v52 = vor.u32 %v211_v18, %v210_v16  ;;  %v215_v3 = vshll.u32 %v214_v43, 23  ;;  %v354_v19 = vshll.u32 %v1473_v51, 30  ;;  %v1032_v18 = vor.u32 %v1091_v11, %v1031_v5  ;;  %v1074_v43 = vld [vmem:[#allocation7 + $0x64] sm:$0xf]  ;;  %753 = vmatpush.bf16.msra.mxu2 %v968_v50 }
  0xcf   :  { %v224_v57 = vsel %vm101_vm7, %v223_v2, %v1451_v28 }
  0xd0   :  { %v216_v62 = vor.u32 4788187, %v215_v3  ;;  %v355_v21 = vsub.s32 %v351_v15, %v354_v19  ;;  %v219_v23 = vcvt.s32.f32 %v212_v52  ;;  %v1044_v15 = vor.u32 %v1092_v0, %v1041_v12  ;;  %v969_v52 = vld [vmem:[#allocation7 + $0x68] sm:$0xf0]  ;;  %767 = vmatpush.bf16.msra.mxu3 %v1032_v18 }
  0xd1   :  { %v972_v8 = vor.u32 %v1074_v43, %v969_v52  ;;  %v226_v0 = vsel %vm1479_vm8, 0, %v224_v57  ;;  %v927_v57 = vld [vmem:[#allocation7 + $0x10] sm:$0xf] }
  0xd2   :  { %v217_v22 = vand.u32 2147483647, %v216_v62  ;;  %vm356_vm6 = vcmp.lt.s32.totalorder %v355_v21, 0  ;;  %v357_v25 = vsub.s32 0, %v355_v21  ;;  %794 = vmatpush.bf16.msrb.mxu1 %v1044_v15  ;;  %v1090_v62 = vld [vmem:[#allocation7 + $0xe4] sm:$0xf] }
  0xd3   :  { %781 = vmatpush.bf16.msrb.mxu0 %v972_v8  ;;  %v243_v15 = vand.u32 3, %v226_v0  ;;  %v919_v0 = vld [vmem:[#allocation7] sm:$0xf] }
  0xd4   :  { %v220_v26 = vmul.f32 %v219_v23, %v217_v22  ;;  %v358_v58 = vsel %vm356_vm6, %v357_v25, %v355_v21  ;;  %v959_v25 = vld [vmem:[#allocation7 + $0x50] sm:$0xf] }
  0xd5   :  { %v359_v27 = vclz %v358_v58  ;;  %v1023_v58 = vld [vmem:[#allocation7 + $0xd0] sm:$0xf]  ;;  %vm245_vm12 = vcmp.eq.s32.totalorder %v243_v15, 0  ;;  %vm248_vm13 = vcmp.eq.s32.totalorder %v243_v15, 2  ;;  %vm244_vm14 = vcmp.lt.s32.totalorder %v243_v15, 2 }
  0xd6   :  { %v221_v37 = vxor.u32 2147483648, %v220_v26  ;;  %v921_v15 = vld [vmem:[#allocation7 + $0x8] sm:$0xf0] }
  0xd7   :  { %v851_v4 = vadd.s32 4294967294, %v359_v27 }
  0xd8   :  { %v222_v55 = vsel %vm101_vm7, %v221_v37, %v220_v26  ;;  %v1073_v26 = vld [vmem:[#allocation7 + $0x54] sm:$0xf0] }
  0xd9   :  { %v1488_v54 = vsel %vm1479_vm8, %v1286_v17, %v222_v55  ;;  %vm852_vm9 = vcmp.lt.s32.totalorder %v851_v4, 0  ;;  %v960_v27 = vor.u32 %v1073_v26, %v959_v25  ;;  %v1089_v55 = vld [vmem:[#allocation7 + $0xd4] sm:$0xf0]  ;;  %v943_v26 = vld [vmem:[#allocation7 + $0x30] sm:$0xf] }
  0xda   :  { %v1492_v29 = vmul.f32 %v1488_v54, %v1488_v54  ;;  %v362_v30 = vsel %vm852_vm9, 0, %v851_v4  ;;  %v1072_v4 = vld [vmem:[#allocation7 + $0x54] sm:$0xf] }
  0xdb   :  { %v363_v32 = vsub.s32 32, %v362_v30  ;;  %v367_v33 = vsub.s32 4294967266, %v362_v30  ;;  %v364_v38 = vshll.u32 %v355_v21, %v362_v30  ;;  %v1033_v21 = vld [vmem:[#allocation7 + $0xe8] sm:$0xf0]  ;;  %v961_v30 = vld [vmem:[#allocation7 + $0x58] sm:$0xf0]  ;;  %754 = vmatpush.bf16.msra.mxu2 %v960_v27 }
  0xdc   :  { %v235_v56 = vmul.f32 -0.00019511016, %v1492_v29  ;;  %v228_v34 = vmul.f32 -0.001358992, %v1492_v29  ;;  %v1036_v23 = vor.u32 %v1090_v62, %v1033_v21  ;;  %v1007_v27 = vld [vmem:[#allocation7 + $0xb0] sm:$0xf] }
  0xdd   :  { %v365_v36 = vshrl.u32 %v347_v31, %v363_v32  ;;  %v368_v39 = vadd.s32 127, %v367_v33  ;;  %v1024_v31 = vor.u32 %v1089_v55, %v1023_v58  ;;  %v964_v32 = vor.u32 %v1072_v4, %v961_v30  ;;  %v1088_v33 = vld [vmem:[#allocation7 + $0xd4] sm:$0xf]  ;;  %v1069_v58 = vld [vmem:[#allocation7 + $0x34] sm:$0xf0] }
  0xde   :  { %v236_v35 = vadd.f32 0.008332121, %v235_v56  ;;  %v229_v46 = vadd.f32 0.041655596, %v228_v34  ;;  %v1025_v34 = vld [vmem:[#allocation7 + $0xd8] sm:$0xf0]  ;;  %795 = vmatpush.bf16.msrb.mxu1 %v1036_v23 }
  0xdf   :  { %v366_v40 = vor.u32 %v365_v36, %v364_v38  ;;  %v369_v42 = vshll.u32 %v368_v39, 23  ;;  %v377_v38 = vsub.s32 4, %v1473_v51  ;;  %v1028_v39 = vor.u32 %v1088_v33, %v1025_v34  ;;  %768 = vmatpush.bf16.msra.mxu3 %v1024_v31  ;;  %782 = vmatpush.bf16.msrb.mxu0 %v964_v32  ;;  %v1085_v55 = vld [vmem:[#allocation7 + $0xb4] sm:$0xf0]  ;;  %v1068_v4 = vld [vmem:[#allocation7 + $0x34] sm:$0xf] }
  0xe0   :  { %v237_v47 = vmul.f32 %v236_v35, %v1492_v29  ;;  %v230_v63 = vmul.f32 %v229_v46, %v1492_v29  ;;  %v951_v35 = vld [vmem:[#allocation7 + $0x40] sm:$0xf]  ;;  %v1008_v30 = vor.u32 %v1085_v55, %v1007_v27  ;;  %v1084_v31 = vld [vmem:[#allocation7 + $0xb4] sm:$0xf]  ;;  %v1009_v32 = vld [vmem:[#allocation7 + $0xb8] sm:$0xf0] }
  0xe1   :  { %v370_v48 = vor.u32 4788187, %v369_v42  ;;  %v373_v24 = vcvt.s32.f32 %v366_v40  ;;  %v1071_v40 = vld [vmem:[#allocation7 + $0x44] sm:$0xf0]  ;;  %v1015_v42 = vld [vmem:[#allocation7 + $0xc0] sm:$0xf]  ;;  %v378_v12 = vsel %vm255_vm10, %v377_v38, %v1473_v51  ;;  %v1012_v33 = vor.u32 %v1084_v31, %v1009_v32 }
  0xe2   :  { %v238_v14 = vadd.f32 -0.16666654, %v237_v47  ;;  %v231_v3 = vadd.f32 -0.4999988, %v230_v63  ;;  %v1016_v59 = vor.u32 %v1087_v49, %v1015_v42  ;;  %796 = vmatpush.bf16.msrb.mxu1 %v1028_v39  ;;  %v380_v53 = vsel %vm1501_vm11, 0, %v378_v12 }
  0xe3   :  { %v371_v20 = vand.u32 2147483647, %v370_v48  ;;  %v952_v48 = vor.u32 %v1071_v40, %v951_v35  ;;  %v397_v18 = vand.u32 3, %v380_v53  ;;  %v1067_v34 = vld [vmem:[#allocation7 + $0x24] sm:$0xf0] }
  0xe4   :  { %v239_v19 = vmul.f32 %v238_v14, %v1492_v29  ;;  %v232_v60 = vmul.f32 %v231_v3, %v1492_v29  ;;  %769 = vmatpush.bf16.msra.mxu3 %v1016_v59  ;;  %v999_v35 = vld [vmem:[#allocation7 + $0xa0] sm:$0xf]  ;;  %v1083_v38 = vld [vmem:[#allocation7 + $0xa4] sm:$0xf0]  ;;  %v1066_v39 = vld [vmem:[#allocation7 + $0x24] sm:$0xf] }
  0xe5   :  { %v374_v7 = vmul.f32 %v373_v24, %v371_v20  ;;  %v1070_v20 = vld [vmem:[#allocation7 + $0x44] sm:$0xf]  ;;  %v953_v24 = vld [vmem:[#allocation7 + $0x48] sm:$0xf0]  ;;  %755 = vmatpush.bf16.msra.mxu2 %v952_v48  ;;  %vm399_vm15 = vcmp.eq.s32.totalorder %v397_v18, 0  ;;  %vm402_vm0 = vcmp.eq.s32.totalorder %v397_v18, 2  ;;  %v1000_v42 = vor.u32 %v1083_v38, %v999_v35 }
  0xe6   :  { %v240_v36 = vadd.f32 1.0, %v239_v19  ;;  %v956_v14 = vor.u32 %v1070_v20, %v953_v24  ;;  %v233_v29 = vadd.f32 1.0, %v232_v60  ;;  %797 = vmatpush.bf16.msrb.mxu1 %v1020_v1  ;;  %vm398_vm1 = vcmp.lt.s32.totalorder %v397_v18, 2  ;;  %v937_v40 = vld [vmem:[#allocation7 + $0x28] sm:$0xf0] }
  0xe7   :  { %v375_v16 = vxor.u32 2147483648, %v374_v7  ;;  %v1001_v48 = vld [vmem:[#allocation7 + $0xa8] sm:$0xf0]  ;;  %v1065_v59 = vld [vmem:[#allocation7 + $0x14] sm:$0xf0] }
  0xe8   :  { %783 = vmatpush.bf16.msrb.mxu0 %v956_v14  ;;  %v249_v11 = vxor.u32 2147483648, %v233_v29  ;;  %770 = vmatpush.bf16.msra.mxu3 %v1008_v30  ;;  %v991_v20 = vld [vmem:[#allocation7 + $0x90] sm:$0xf]  ;;  %v928_v24 = vor.u32 %v1065_v59, %v927_v57  ;;  %v1064_v60 = vld [vmem:[#allocation7 + $0x14] sm:$0xf] }
  0xe9   :  { %v376_v22 = vsel %vm255_vm10, %v375_v16, %v374_v7  ;;  %v241_v7 = vmul.f32 %v240_v36, %v1488_v54  ;;  %v993_v1 = vld [vmem:[#allocation7 + $0x98] sm:$0xf0]  ;;  %v1079_v12 = vld [vmem:[#allocation7 + $0x84] sm:$0xf0]  ;;  %v586_v30 = vld [vmem:[%s1543_s7] sm:$0x3] }
  0xea   :  { %v379_v37 = vsel %vm1501_vm11, %v1297_v44, %v376_v22  ;;  %v935_v44 = vld [vmem:[#allocation7 + $0x20] sm:$0xf]  ;;  %798 = vmatpush.bf16.msrb.mxu1 %v1012_v33  ;;  %v813_v33 = vstv %s1045_s27 }
  0xeb   :  { %v381_v56 = vmul.f32 %v379_v37, %v379_v37  ;;  %v246_v50 = vxor.u32 2147483648, %v241_v7  ;;  %v250_v3 = vsel %vm248_vm13, %v249_v11, %v241_v7  ;;  %v936_v36 = vor.u32 %v1067_v34, %v935_v44  ;;  %v424_v11 = vld [vmem:[%s1541_s5] sm:$0x3] }
  0xec   :  { %771 = vmatpush.bf16.msra.mxu3 %v1000_v42  ;;  %v996_v7 = vor.u32 %v1080_v45, %v993_v1  ;;  %v426_v18 = vperm.slane %v424_v11, 0  ;;  %v588_v44 = vperm.slane %v586_v30, 0 }
  0xed   :  { %v382_v46 = vmul.f32 -0.001358992, %v381_v56  ;;  %v389_v47 = vmul.f32 -0.00019511016, %v381_v56  ;;  %v247_v43 = vsel %vm245_vm12, %v233_v29, %v246_v50  ;;  %v1078_v50 = vld [vmem:[#allocation7 + $0x84] sm:$0xf] }
  0xee   :  { %v251_v8 = vsel %vm244_vm14, %v247_v43, %v250_v3  ;;  %v427_v43 = vperm.slane %v424_v11, 1  ;;  %v543_v3 = vstv %s538_s3 }
  0xef   :  { %v383_v61 = vadd.f32 0.041655596, %v382_v46  ;;  %v390_v63 = vadd.f32 0.008332121, %v389_v47  ;;  %v252_v22 = vsel %vm242_vm2, nan, %v251_v8  ;;  %v940_v46 = vor.u32 %v1066_v39, %v937_v40 }
  0xf0   :  { %v1082_v47 = vld [vmem:[#allocation7 + $0xa4] sm:$0xf] }
  0xf1   :  { %v384_v28 = vmul.f32 %v383_v61, %v381_v56  ;;  %v391_v10 = vmul.f32 %v390_v63, %v381_v56  ;;  %v1004_v49 = vor.u32 %v1082_v47, %v1001_v48  ;;  %v929_v61 = vld [vmem:[#allocation7 + $0x18] sm:$0xf0]  ;;  %v992_v63 = vor.u32 %v1081_v9, %v991_v20 }
  0xf2   :  { %v932_v14 = vor.u32 %v1064_v60, %v929_v61 }
  0xf3   :  { %v385_v13 = vadd.f32 -0.4999988, %v384_v28  ;;  %v392_v41 = vadd.f32 -0.16666654, %v391_v10  ;;  %799 = vmatpush.bf16.msrb.mxu1 %v1004_v49  ;;  %v1063_v28 = vld [vmem:[#allocation7 + $0x4] sm:$0xf0]  ;;  %772 = vmatpush.bf16.msra.mxu3 %v992_v63 }
  0xf4   :  { %v983_v10 = vld [vmem:[#allocation7 + $0x80] sm:$0xf]  ;;  %v920_v29 = vor.u32 %v1063_v28, %v919_v0 }
  0xf5   :  { %v386_v5 = vmul.f32 %v385_v13, %v381_v56  ;;  %v393_v54 = vmul.f32 %v392_v41, %v381_v56  ;;  %v945_v56 = vld [vmem:[#allocation7 + $0x38] sm:$0xf0]  ;;  %v984_v13 = vor.u32 %v1079_v12, %v983_v10  ;;  %v1062_v41 = vld [vmem:[#allocation7 + $0x4] sm:$0xf] }
  0xf6   :  { %v948_v17 = vor.u32 %v1068_v4, %v945_v56  ;;  %v924_v53 = vor.u32 %v1062_v41, %v921_v15  ;;  %v589_v56 = vperm.slane %v586_v30, 1 }
  0xf7   :  { %v387_v2 = vadd.f32 1.0, %v386_v5  ;;  %v394_v16 = vadd.f32 1.0, %v393_v54  ;;  %800 = vmatpush.bf16.msrb.mxu1 %v996_v7  ;;  %v985_v5 = vld [vmem:[#allocation7 + $0x88] sm:$0xf0]  ;;  %773 = vmatpush.bf16.msra.mxu3 %v984_v13 }
  0xf8   :  { %784 = vmatpush.bf16.msrb.mxu0 %v948_v17  ;;  %v988_v54 = vor.u32 %v1078_v50, %v985_v5 }
  0xf9   :  { %v395_v51 = vmul.f32 %v394_v16, %v379_v37  ;;  %v403_v52 = vxor.u32 2147483648, %v387_v2  ;;  %v944_v37 = vor.u32 %v1069_v58, %v943_v26 }
  0xfb   :  { %v400_v19 = vxor.u32 2147483648, %v395_v51  ;;  %v404_v62 = vsel %vm402_vm0, %v403_v52, %v395_v51  ;;  %756 = vmatpush.bf16.msra.mxu2 %v944_v37  ;;  %801 = vmatpush.bf16.msrb.mxu1 %v988_v54 }
  0xfc   :  { %785 = vmatpush.bf16.msrb.mxu0 %v940_v46 }
  0xfd   :  { %v401_v6 = vsel %vm399_vm15, %v387_v2, %v400_v19 }
  0xfe   :  { %v405_v21 = vsel %vm398_vm1, %v401_v6, %v404_v62 }
  0xff   :  { %v406_v23 = vsel %vm396_vm3, nan, %v405_v21  ;;  %757 = vmatpush.bf16.msra.mxu2 %v936_v36 }
 0x100   :  { %v407_v25 = vpack.c.bf16 %v406_v23, %v252_v22  ;;  %786 = vmatpush.bf16.msrb.mxu0 %v932_v14 }
 0x102   :  { %518 = vmatmul.bf16.vlgmr.msra.gmra.mxu0 %v407_v25  ;;  %532 = vmatmul.bf16.vlgmr.msra.gmra.mxu1 %v407_v25 }
 0x103   :  { %758 = vmatpush.bf16.msra.mxu2 %v928_v24 }
 0x104   :  { %787 = vmatpush.bf16.msrb.mxu0 %v924_v53 }
 0x107   :  { %759 = vmatpush.bf16.msra.mxu2 %v920_v29 }
 0x17f   :  { %v519_v2 = vpop.f32.mrf.mxu0  ;;  %v533_v16 = vpop.f32.mrf.mxu1 }
 0x180   :  { %v520_v51 = vadd.f32 %v519_v2, %v426_v18  ;;  %v534_v52 = vadd.f32 %v533_v16, %v427_v43 }
 0x182   :  { %v544_v6 = vmul.f32 %v543_v3, %v520_v51  ;;  %v545_v62 = vmul.f32 %v543_v3, %v534_v52  ;;  %vm539_vm4 = vcmp.ge.f32.partialorder %v520_v51, 0.0  ;;  %vm540_vm5 = vcmp.ge.f32.partialorder %v534_v52, 0.0 }
 0x184   :  { %v548_v26 = vsel %vm539_vm4, %v520_v51, %v544_v6  ;;  %v549_v37 = vsel %vm540_vm5, %v534_v52, %v545_v62 }
 0x187   :  { %v521_v19 = vpop.f32.mrf.mxu0  ;;  %v535_v8 = vpop.f32.mrf.mxu1 }
 0x188   :  { %v522_v21 = vadd.f32 %v521_v19, %v426_v18  ;;  %v536_v22 = vadd.f32 %v535_v8, %v427_v43 }
 0x18a   :  { %v546_v23 = vmul.f32 %v543_v3, %v522_v21  ;;  %v547_v25 = vmul.f32 %v543_v3, %v536_v22  ;;  %vm541_vm6 = vcmp.ge.f32.partialorder %v522_v21, 0.0  ;;  %vm542_vm7 = vcmp.ge.f32.partialorder %v536_v22, 0.0 }
 0x18c   :  { %v550_v58 = vsel %vm541_vm6, %v522_v21, %v546_v23  ;;  %v551_v27 = vsel %vm542_vm7, %v536_v22, %v547_v25 }
 0x18d   :  { %v552_v55 = vpack.c.bf16 %v550_v58, %v548_v26  ;;  %v553_v4 = vpack.c.bf16 %v551_v27, %v549_v37 }
 0x18f   :  { %760 = vmatmul.bf16.vlgmr.msra.gmra.mxu2 %v552_v55  ;;  %774 = vmatmul.bf16.vlgmr.msra.gmra.mxu3 %v553_v4 }
 0x190   :  { %788 = vmatmul.bf16.vlgmr.msrb.gmra.mxu0 %v552_v55  ;;  %802 = vmatmul.bf16.vlgmr.msrb.gmra.mxu1 %v553_v4 }
 0x20d   :  { %v789_v31 = vpop.f32.mrf.mxu0  ;;  %v803_v32 = vpop.f32.mrf.mxu1 }
 0x20e   :  { %v790_v17 = vadd.f32 %v789_v31, %v589_v56 }
 0x210   :  { %v804_v34 = vadd.f32 %v803_v32, %v790_v17 }
 0x212   :  { %vm810_vm8 = vcmp.ge.f32.partialorder %v804_v34, 0.0  ;;  %v815_v35 = vmul.f32 %v813_v33, %v804_v34  ;;  %v761_v36 = vpop.f32.mrf.mxu2  ;;  %v775_v38 = vpop.f32.mrf.mxu3 }
 0x213   :  { %v762_v39 = vadd.f32 %v761_v36, %v588_v44 }
 0x214   :  { %v819_v40 = vsel %vm810_vm8, %v804_v34, %v815_v35 }
 0x215   :  { %823 = vst [vmem:[#allocation9 + $0x8] sm:$0xff] %v819_v40  ;;  %v776_v42 = vadd.f32 %v775_v38, %v762_v39  ;;  %v791_v46 = vpop.f32.mrf.mxu0  ;;  %v805_v49 = vpop.f32.mrf.mxu1 }
 0x216   :  { %v792_v47 = vadd.f32 %v791_v46, %v589_v56 }
 0x217   :  { %vm809_vm9 = vcmp.ge.f32.partialorder %v776_v42, 0.0  ;;  %v814_v48 = vmul.f32 %v813_v33, %v776_v42 }
 0x218   :  { %v806_v57 = vadd.f32 %v805_v49, %v792_v47 }
 0x219   :  { %v818_v59 = vsel %vm809_vm9, %v776_v42, %v814_v48 }
 0x21a   :  { %822 = vst [vmem:[#allocation9] sm:$0xff] %v818_v59  ;;  %vm812_vm10 = vcmp.ge.f32.partialorder %v806_v57, 0.0  ;;  %v817_v20 = vmul.f32 %v813_v33, %v806_v57  ;;  %v763_v24 = vpop.f32.mrf.mxu2  ;;  %v777_v61 = vpop.f32.mrf.mxu3 }
 0x21b   :  { %v764_v9 = vadd.f32 %v763_v24, %v588_v44 }
 0x21c   :  { %v821_v60 = vsel %vm812_vm10, %v806_v57, %v817_v20 }
 0x21d   :  { %825 = vst [vmem:[#allocation9 + $0x18] sm:$0xff] %v821_v60  ;;  %v778_v63 = vadd.f32 %v777_v61, %v764_v9 }
 0x21f   :  { %vm811_vm11 = vcmp.ge.f32.partialorder %v778_v63, 0.0  ;;  %v816_v14 = vmul.f32 %v813_v33, %v778_v63 }
 0x221   :  { %v820_v45 = vsel %vm811_vm11, %v778_v63, %v816_v14 }
 0x222   :  { %824 = vst [vmem:[#allocation9 + $0x10] sm:$0xff] %v820_v45 }
 0x223   :  { %829 = vsyncadd [#allocation4], 256  ;;  %s832_s29 = sshll.u32 %s1544_s8, 4  ;;  %s1216_s30 = smov [#allocation9]   ;;  %s833_s29 = int_to_ptr.hbm [resolvable:$true] %s832_s29 }
 0x224   :  { %s830_s9 = sshll.u32 %s1216_s30, 4  ;;  %s1217_s10 = smov 256   ;;  %s831_s9 = int_to_ptr.vmem [resolvable:$true] %s830_s9 }
 0x225   :  { %s1218_s11 = smov 16  }
 0x226   :  { %838 = dma.vmem_to_hbm [thread:$0]  %s831_s9, 256, %s833_s29, [#allocation4], %s1217_s10, %s1217_s10, %s1218_s11  }
 0x227   :  { %1202 = dma.done.wait [#allocation4], 512  }
 0x228   :  { %1203 = vsyncadd [#allocation4], 4294966784 }
 0x229   :  { %843 = vsyncpa [#allocation3], 1 }
 0x22a   :  { %844 = vsyncpa [#allocation8], 1 }
 0x22b   :  { %845 = vsyncpa [#allocation4], 1 }
 0x22c   :  { %846 = vsyncpa [#allocation5], 1 }

</bundles_post_ra>
